<compile_context>
chip_gen: v7x
topology: tpu7x:2x2x1
jax: 0.10.0
libtpu: 0.0.40
codegen_flags: <defaults>
</compile_context>

<pallas_src>
import jax
import jax.numpy as jnp
from jax import lax
from jax.experimental import pallas as pl
from jax.experimental.pallas import tpu as pltpu

_LANES = 128
_BOXES_PER_SUBLANE = _LANES // 4          # 32 boxes per (·,128) row
_MAX_TILE_SUB = 4096                      # per-input block: 4096*128*4B = 2 MiB


def _cdiv(a, b):
    return -(-a // b)


def _iou_loss_kernel(p_ref, t_ref, o_ref):
    # p_ref, t_ref: (T, 128) f32 -- lanes 4k..4k+3 = (x1, y1, x2, y2) of one box.
    # o_ref:        (8, 128) f32 -- per-tile partial IoU sums (lanes 4k only).
    p = p_ref[...]
    t = t_ref[...]

    lt = jnp.maximum(p, t)                       # valid at lanes 4k, 4k+1 (x1, y1)
    rb = jnp.minimum(p, t)                       # valid at lanes 4k+2, 4k+3 (x2, y2)

    # Lane rotations: shift 126 == -2 (mod 128), shift 127 == -1 (mod 128);
    # they bring the x2/y2 (resp. h) lane down onto the x1/w lane.
    wh = jnp.maximum(pltpu.roll(rb, shift=126, axis=1) - lt, 0.0)   # 4k: w, 4k+1: h
    inter = wh * pltpu.roll(wh, shift=127, axis=1)                  # 4k: w*h

    p_d = pltpu.roll(p, shift=126, axis=1) - p                      # 4k: pw, 4k+1: ph
    t_d = pltpu.roll(t, shift=126, axis=1) - t
    area_p = p_d * pltpu.roll(p_d, shift=127, axis=1)               # 4k: pw*ph
    area_t = t_d * pltpu.roll(t_d, shift=127, axis=1)

    union = area_p + area_t - inter
    # approx=False keeps ~1-ulp parity with inter/union; approx=True would move
    # the divide fully onto the EUP slot if bit accuracy were not required.
    iou = inter * pl.reciprocal(union, approx=False)                # valid at 4k only

    # Fold sublanes in groups of 8 (same-lane VPU adds), then zero non-IoU lanes.
    tsub = p.shape[0]
    part = iou.reshape(tsub // 8, 8, _LANES).sum(axis=0)            # (8, 128)
    lane = lax.broadcasted_iota(jnp.int32, (8, _LANES), 1)
    o_ref[...] = jnp.where(lane % 4 == 0, part, 0.0)


@jax.jit
def iou_loss(pred: jax.Array, target: jax.Array) -> jax.Array:
    """pred, target: [N, 4] boxes (x1, y1, x2, y2). Returns scalar 1 - mean IoU."""
    assert pred.shape == target.shape and pred.ndim == 2 and pred.shape[-1] == 4
    n = pred.shape[0]

    # Static tile sizing from shapes.
    s = _cdiv(n, _BOXES_PER_SUBLANE)             # sublanes of the (S,128) view
    s8 = _cdiv(s, 8) * 8                         # (8,128) tiling alignment
    half = _cdiv(s8, 16) * 8                     # aim for >=2 grid steps (v7x: 2 TCs)
    tile_cap = max(8, min(_MAX_TILE_SUB, half))
    num_tiles = _cdiv(s8, tile_cap)
    tile_sub = _cdiv(_cdiv(s8, num_tiles), 8) * 8  # balanced tiles, minimal padding
    s_pad = num_tiles * tile_sub
    n_pad = s_pad * _BOXES_PER_SUBLANE

    def to_lanes(boxes, pad_box):
        b = boxes.astype(jnp.float32)
        if n_pad != n:
            # Non-intersecting dummy boxes -> IoU of padded slots is exactly 0.
            pad = jnp.broadcast_to(jnp.asarray(pad_box, jnp.float32), (n_pad - n, 4))
            b = jnp.concatenate([b, pad], axis=0)
        # Free row-major reshape; lanes 4k..4k+3 of row r = box 32*r + k.
        return b.reshape(s_pad, _LANES)

    p2 = to_lanes(pred, (0.0, 0.0, 0.0, 0.0))
    t2 = to_lanes(target, (1.0, 1.0, 2.0, 2.0))

    partials = pl.pallas_call(
        _iou_loss_kernel,
        out_shape=jax.ShapeDtypeStruct((num_tiles * 8, _LANES), jnp.float32),
        grid=(num_tiles,),
        in_specs=[pl.BlockSpec((tile_sub, _LANES), lambda i: (i, 0)),
                  pl.BlockSpec((tile_sub, _LANES), lambda i: (i, 0))],
        out_specs=pl.BlockSpec((8, _LANES), lambda i: (i, 0)),
        compiler_params=pltpu.CompilerParams(
            dimension_semantics=("parallel",),
            vmem_limit_bytes=48 * 1024 * 1024,
        ),
    )(p2, t2)

    # Tiny final reduce + mean in the wrapper (padded / non-IoU lanes are 0).
    return 1.0 - jnp.sum(partials) / jnp.float32(n)


def _reference_iou_loss(pred, target):
    # Pure-JAX reference (mirrors torchvision box_iou diagonal).
    px1, py1, px2, py2 = [pred[:, i] for i in range(4)]
    tx1, ty1, tx2, ty2 = [target[:, i] for i in range(4)]
    area_p = (px2 - px1) * (py2 - py1)
    area_t = (tx2 - tx1) * (ty2 - ty1)
    w = jnp.clip(jnp.minimum(px2, tx2) - jnp.maximum(px1, tx1), 0.0, None)
    h = jnp.clip(jnp.minimum(py2, ty2) - jnp.maximum(py1, ty1), 0.0, None)
    inter = w * h
    iou = inter / (area_p + area_t - inter)
    return 1.0 - jnp.mean(iou)


if __name__ == "__main__":
    key = jax.random.PRNGKey(0)

    def make_boxes(k, n):
        xy = jax.random.uniform(k, (n, 2), jnp.float32, 0.0, 8.0)
        wh = jax.random.uniform(jax.random.fold_in(k, 1), (n, 2),
                                jnp.float32, 1.0, 8.0)
        return jnp.concatenate([xy, xy + wh], axis=-1)  # valid x1<x2, y1<y2

    # One ragged case (exercises padding) and one aligned multi-tile case
    # (exercises the 2-step "parallel" grid with no wrapper copies at all).
    for n in (100, 2048):
        k1, k2 = jax.random.split(jax.random.fold_in(key, n))
        pred = make_boxes(k1, n)
        target = make_boxes(k2, n)
        loss = jax.block_until_ready(iou_loss(pred, target))
        ref = _reference_iou_loss(pred, target)
        assert jnp.allclose(loss, ref, atol=1e-5, rtol=1e-4), (n, loss, ref)

    print("KERNEL_OK")
</pallas_src>

<mosaic_0001>
module attributes {stable_mosaic.version = 11 : i64} {
  func.func @_iou_loss_kernel(%arg0: i32, %arg1: memref<8x128xf32, #tpu.memory_space<vmem>>, %arg2: memref<8x128xf32, #tpu.memory_space<vmem>>, %arg3: memref<8x128xf32, #tpu.memory_space<vmem>>) attributes {dimension_semantics = [#tpu.dimension_semantics<parallel>], iteration_bounds = array<i64: 1>, scalar_prefetch = 0 : i64, scratch_operands = 0 : i64, tpu.core_type = #tpu.core_type<tc>, window_params = [{transform_indices = @transform_0, window_bounds = array<i64: 8, 128>}, {transform_indices = @transform_1, window_bounds = array<i64: 8, 128>}, {transform_indices = @transform_2, window_bounds = array<i64: 8, 128>}]} {
    %c0 = arith.constant 0 : index
    %c0_0 = arith.constant 0 : index
    %0 = vector.load %arg1[%c0, %c0_0] : memref<8x128xf32, #tpu.memory_space<vmem>>, vector<8x128xf32>
    %c0_1 = arith.constant 0 : index
    %c0_2 = arith.constant 0 : index
    %1 = vector.load %arg2[%c0_1, %c0_2] : memref<8x128xf32, #tpu.memory_space<vmem>>, vector<8x128xf32>
    %2 = arith.maximumf %0, %1 : vector<8x128xf32>
    %3 = arith.minimumf %0, %1 : vector<8x128xf32>
    %c126_i32 = arith.constant 126 : i32
    %4 = tpu.dynamic_rotate %3 by %c126_i32 dim 1 : vector<8x128xf32>, i32 -> vector<8x128xf32>
    %5 = arith.subf %4, %2 : vector<8x128xf32>
    %cst = arith.constant 0.000000e+00 : f32
    %6 = vector.broadcast %cst : f32 to vector<8x128xf32>
    %7 = arith.maximumf %5, %6 : vector<8x128xf32>
    %c127_i32 = arith.constant 127 : i32
    %8 = tpu.dynamic_rotate %7 by %c127_i32 dim 1 : vector<8x128xf32>, i32 -> vector<8x128xf32>
    %9 = arith.mulf %7, %8 : vector<8x128xf32>
    %c126_i32_3 = arith.constant 126 : i32
    %10 = tpu.dynamic_rotate %0 by %c126_i32_3 dim 1 : vector<8x128xf32>, i32 -> vector<8x128xf32>
    %11 = arith.subf %10, %0 : vector<8x128xf32>
    %c126_i32_4 = arith.constant 126 : i32
    %12 = tpu.dynamic_rotate %1 by %c126_i32_4 dim 1 : vector<8x128xf32>, i32 -> vector<8x128xf32>
    %13 = arith.subf %12, %1 : vector<8x128xf32>
    %c127_i32_5 = arith.constant 127 : i32
    %14 = tpu.dynamic_rotate %11 by %c127_i32_5 dim 1 : vector<8x128xf32>, i32 -> vector<8x128xf32>
    %15 = arith.mulf %11, %14 : vector<8x128xf32>
    %c127_i32_6 = arith.constant 127 : i32
    %16 = tpu.dynamic_rotate %13 by %c127_i32_6 dim 1 : vector<8x128xf32>, i32 -> vector<8x128xf32>
    %17 = arith.mulf %13, %16 : vector<8x128xf32>
    %18 = arith.addf %15, %17 : vector<8x128xf32>
    %19 = arith.subf %18, %9 : vector<8x128xf32>
    %20 = tpu.reciprocal %19 : vector<8x128xf32> -> vector<8x128xf32>
    %21 = arith.mulf %9, %20 : vector<8x128xf32>
    %22 = vector.shape_cast %21 : vector<8x128xf32> to vector<1x8x128xf32>
    %cst_7 = arith.constant dense<0.000000e+00> : vector<8x128xf32>
    %23 = vector.multi_reduction <add>, %22, %cst_7 [0] : vector<1x8x128xf32> to vector<8x128xf32>
    %24 = tpu.iota {dimensions = array<i32: 1>} : vector<8x128xi32>
    %c4_i32 = arith.constant 4 : i32
    %c0_i32 = arith.constant 0 : i32
    %25 = arith.cmpi eq, %c4_i32, %c0_i32 : i32
    %c1_i32 = arith.constant 1 : i32
    %26 = arith.select %25, %c1_i32, %c4_i32 : i32
    %27 = vector.broadcast %26 : i32 to vector<8x128xi32>
    %28 = arith.remsi %24, %27 : vector<8x128xi32>
    %c0_i32_8 = arith.constant 0 : i32
    %29 = vector.broadcast %c0_i32_8 : i32 to vector<8x128xi32>
    %30 = arith.cmpi ne, %28, %29 : vector<8x128xi32>
    %c0_i32_9 = arith.constant 0 : i32
    %31 = vector.broadcast %c0_i32_9 : i32 to vector<8x128xi32>
    %32 = arith.cmpi slt, %28, %31 : vector<8x128xi32>
    %c0_i32_10 = arith.constant 0 : i32
    %33 = arith.cmpi slt, %26, %c0_i32_10 : i32
    %34 = vector.broadcast %33 : i1 to vector<8x128xi1>
    %35 = vector.broadcast %34 : vector<8x128xi1> to vector<8x128xi1>
    %36 = arith.xori %32, %35 : vector<8x128xi1>
    %37 = arith.andi %36, %30 : vector<8x128xi1>
    %38 = vector.broadcast %26 : i32 to vector<8x128xi32>
    %39 = arith.addi %28, %38 : vector<8x128xi32>
    %40 = arith.select %37, %39, %28 : vector<8x128xi1>, vector<8x128xi32>
    %c0_i32_11 = arith.constant 0 : i32
    %41 = vector.broadcast %c0_i32_11 : i32 to vector<8x128xi32>
    %42 = arith.cmpi eq, %40, %41 : vector<8x128xi32>
    %cst_12 = arith.constant 0.000000e+00 : f32
    %43 = vector.broadcast %cst_12 : f32 to vector<8x128xf32>
    %44 = arith.select %42, %23, %43 : vector<8x128xi1>, vector<8x128xf32>
    %c0_13 = arith.constant 0 : index
    %c0_14 = arith.constant 0 : index
    %45 = vector.load %arg3[%c0_13, %c0_14] : memref<8x128xf32, #tpu.memory_space<vmem>>, vector<8x128xf32>
    tpu.vector_store %arg3[%c0_13, %c0_14], %44 {strides = array<i32>} : memref<8x128xf32, #tpu.memory_space<vmem>>, vector<8x128xf32>,
    return
  }
  func.func @transform_0(%arg0: i32) -> (i32, i32) {
    %c0_i32 = arith.constant 0 : i32
    %c0_i32_0 = arith.constant 0 : i32
    return %arg0, %c0_i32 : i32, i32
  }
  func.func @transform_1(%arg0: i32) -> (i32, i32) {
    %c0_i32 = arith.constant 0 : i32
    %c0_i32_0 = arith.constant 0 : i32
    return %arg0, %c0_i32 : i32, i32
  }
  func.func @transform_2(%arg0: i32) -> (i32, i32) {
    %c0_i32 = arith.constant 0 : i32
    %c0_i32_0 = arith.constant 0 : i32
    return %arg0, %c0_i32 : i32, i32
  }
}

</mosaic_0001>

<bundles_post_ra>
// kernel: iou_loss.1
= control target key start
LH: loop header
LB: loop body
LE: loop exit
PB: predicated region body
PF: predicated region fallthrough
CT: control target
= control target key end

     0   :  { %s64_s13 = smov 126   ;;  %s65_s14 = smov 127   ;;  %v39_v18 = vlaneseq  ;;  %s90_s1 = inlined_call_operand.vmem [shape: f32[8,128], index: 1, kind: input, shape index: {}]   ;;  %s91_s0 = inlined_call_operand.vmem [shape: f32[8,128], index: 0, kind: input, shape index: {}]   ;;  %s92_s2 = inlined_call_operand.vmem [shape: f32[8,128], index: 2, kind: output, shape index: {}]  }
   0x1   :  { %v12_v0 = vld [vmem:[%s90_s1] sm:$0xff] }
   0x2   :  { %v11_v1 = vld [vmem:[%s91_s0] sm:$0xff]  ;;  %25 = vrot.lane.b32.xlu1 %v12_v0, %s64_s13  ;;  %v40_v20 = vand.u32 127, %v39_v18 }
   0x3   :  { %v14_v2 = vmin.f32 %v11_v1, %v12_v0  ;;  %v13_v6 = vmax.f32 %v11_v1, %v12_v0 }
   0x4   :  { %v45_v21 = vand.u32 3, %v40_v20 }
   0x5   :  { %15 = vrot.lane.b32.xlu0 %v14_v2, %s64_s13 }
   0x6   :  { %vm53_vm0 = vcmp.eq.s32.totalorder %v45_v21, 0 }
   0x9   :  { %22 = vrot.lane.b32.xlu0 %v11_v1, %s64_s13 }
  0x74   :  { %v26_v3 = vpop.permute.xlu1 %25 }
  0x75   :  { %v27_v4 = vsub.f32 %v26_v3, %v12_v0 }
  0x77   :  { %v16_v5 = vpop.permute.xlu0 %15  ;;  %31 = vrot.lane.b32.xlu0 %v27_v4, %s65_s14 }
  0x78   :  { %v17_v8 = vsub.f32 %v16_v5, %v13_v6 }
  0x7a   :  { %v18_v10 = vmax.f32 %v17_v8, 0.0 }
  0x7b   :  { %v23_v7 = vpop.permute.xlu0 %22 }
  0x7c   :  { %v24_v9 = vsub.f32 %v23_v7, %v11_v1 }
  0x7e   :  { %28 = vrot.lane.b32.xlu1 %v24_v9, %s65_s14 }
  0x82   :  { %19 = vrot.lane.b32.xlu1 %v18_v10, %s65_s14 }
  0xe9   :  { %v32_v11 = vpop.permute.xlu0 %31 }
  0xea   :  { %v33_v14 = vmul.f32 %v32_v11, %v27_v4 }
  0xf0   :  { %v29_v12 = vpop.permute.xlu1 %28 }
  0xf1   :  { %v30_v13 = vmul.f32 %v29_v12, %v24_v9 }
  0xf3   :  { %v34_v16 = vadd.f32 %v33_v14, %v30_v13 }
  0xf4   :  { %v20_v15 = vpop.permute.xlu1 %19 }
  0xf5   :  { %v21_v17 = vmul.f32 %v20_v15, %v18_v10 }
  0xf7   :  { %v35_v19 = vsub.f32 %v34_v16, %v21_v17 }
  0xf9   :  { %62 = vrcp.f32 %v35_v19 }
 0x103   :  { %v63_v22 = vpop.eup %62 }
 0x104   :  { %v37_v23 = vmul.f32 %v63_v22, %v21_v17 }
 0x106   :  { %v54_v24 = vsel %vm53_vm0, %v37_v23, 0.0 }
 0x107   :  { %55 = vst [vmem:[%s92_s2] sm:$0xff] %v54_v24 }

</bundles_post_ra>
